<compile_context>
chip_gen: v7x
topology: tpu7x:2x2x1
jax: 0.10.0
libtpu: 0.0.40
codegen_flags: <defaults>
</compile_context>

<pallas_src>
import jax
import jax.numpy as jnp
from jax.experimental import pallas as pl
from jax.experimental.pallas import tpu as pltpu

# ---- module hyper-parameters (small, consistent with the torch module) ----
INPUT_DIM = 16
HIDDEN_DIMS = [32, 32]
LATENT_DIM = 8
N_COMPONENTS = 4
BATCH = 8
BN_EPS = 1e-5  # torch.nn.BatchNorm1d default

# ---- slab layouts ---------------------------------------------------------
W_COLS = max(HIDDEN_DIMS + [2 * LATENT_DIM, INPUT_DIM])   # 32
ACT_WIDTH = 128                                            # lane-dense input slab
OUT_WIDTH = 128                                            # lane-dense output slab

# packed output lane offsets
O_XR = 0
O_MU = O_XR + INPUT_DIM
O_LV = O_MU + LATENT_DIM
O_Z = O_LV + LATENT_DIM
O_G = O_Z + LATENT_DIM
OUT_USED = O_G + N_COMPONENTS


def _num_param_rows():
    rows = 0
    prev = INPUT_DIM
    for d in HIDDEN_DIMS:
        rows += prev + 3          # W rows + (b, gamma, beta)
        prev = d
    rows += prev + 1              # fused fc_mu|fc_logvar W + bias
    prev = LATENT_DIM
    for d in reversed(HIDDEN_DIMS):
        rows += prev + 3
        prev = d
    rows += prev + 1              # output Linear W + bias
    rows += 2 * LATENT_DIM + 1    # folded GMM matrix A (2D rows) + const row
    return rows


P_ROWS_USED = _num_param_rows()
P_ROWS = ((P_ROWS_USED + 7) // 8) * 8


# ---------------------------------------------------------------------------
# Fused forward + responsibilities kernel (grid=(), everything in VMEM)
# ---------------------------------------------------------------------------
def _vae_gmm_fused_kernel(act_ref, p_ref, out_ref):
    f32 = jnp.float32
    cur = [0]

    def take_w(n_rows, n_cols):
        r = cur[0]
        cur[0] += n_rows
        return p_ref[pl.ds(r, n_rows), pl.ds(0, n_cols)]

    def take_v(n_cols):
        r = cur[0]
        cur[0] += 1
        return p_ref[pl.ds(r, 1), pl.ds(0, n_cols)]          # (1, n) row read

    def linear(h, w, b):
        return jnp.dot(h, w, preferred_element_type=f32) + b

    def bn_train(h, g, beta):
        # training-mode BatchNorm1d with biased batch stats; independent sums
        # of h and h*h (var = E[h^2] - E[h]^2) instead of a dependent
        # mean -> subtract -> square -> reduce chain; rsqrt goes to the EUP.
        inv_n = 1.0 / h.shape[0]
        mean = jnp.sum(h, axis=0, keepdims=True) * inv_n
        mean_sq = jnp.sum(h * h, axis=0, keepdims=True) * inv_n
        var = jnp.maximum(mean_sq - mean * mean, 0.0)
        return (h - mean) * jax.lax.rsqrt(var + BN_EPS) * g + beta

    x = act_ref[:, 0:INPUT_DIM].astype(f32)
    eps = act_ref[:, INPUT_DIM:INPUT_DIM + LATENT_DIM].astype(f32)

    # ---- encoder: [Linear -> ReLU -> BatchNorm1d] * len(hidden_dims) ----
    h = x
    prev = INPUT_DIM
    for d in HIDDEN_DIMS:
        w = take_w(prev, d)
        b = take_v(d)
        g = take_v(d)
        beta = take_v(d)
        h = bn_train(jnp.maximum(linear(h, w, b), 0.0), g, beta)
        prev = d

    # ---- fc_mu and fc_logvar fused into ONE matmul, static lane split ----
    w_ml = take_w(prev, 2 * LATENT_DIM)
    b_ml = take_v(2 * LATENT_DIM)
    ml = linear(h, w_ml, b_ml)
    mu = ml[:, 0:LATENT_DIM]
    logvar = ml[:, LATENT_DIM:2 * LATENT_DIM]

    # ---- reparameterize (eps supplied externally for determinism) ----
    z = mu + eps * jnp.exp(0.5 * logvar)

    # ---- decoder: [Linear -> ReLU -> BatchNorm1d] * len(hidden_dims) + Linear ----
    hd = z
    prev = LATENT_DIM
    for d in reversed(HIDDEN_DIMS):
        w = take_w(prev, d)
        b = take_v(d)
        g = take_v(d)
        beta = take_v(d)
        hd = bn_train(jnp.maximum(linear(hd, w, b), 0.0), g, beta)
        prev = d
    w_out = take_w(prev, INPUT_DIM)
    b_out = take_v(INPUT_DIM)
    x_recon = linear(hd, w_out, b_out)

    # ---- GMM responsibilities; parameter-only math hoisted to pack time ----
    #   log_p[n,c] = [z*z, z] @ A  +  const
    # where A = [[-0.5/cov], [mu/cov]] and const folds log-det, mu^T Sigma^-1 mu
    # and log-softmax mixture weights. One small MXU matmul on the tail.
    a_mat = take_w(2 * LATENT_DIM, N_COMPONENTS)            # (2D, C)
    a_const = take_v(N_COMPONENTS)                          # (1, C)
    zz = jnp.concatenate([z * z, z], axis=1)                # (B, 2D)
    log_p = jnp.dot(zz, a_mat, preferred_element_type=f32) + a_const
    gamma = jnp.exp(log_p - jax.nn.logsumexp(log_p, axis=1, keepdims=True))

    # ---- single unmasked lane-dense store of all results ----
    pad = jnp.zeros((x.shape[0], OUT_WIDTH - OUT_USED), f32)
    out_ref[...] = jnp.concatenate([x_recon, mu, logvar, z, gamma, pad], axis=1)


@jax.jit
def vae_gmm_forward_with_gamma(x, eps, p_slab):
    """Returns (x_recon, mu, logvar, z, gamma) from one fused Pallas kernel."""
    batch = x.shape[0]
    # Pack x and eps into one lane-dense activation slab -> 2 input DMAs total.
    act = jnp.concatenate([x.astype(jnp.float32), eps.astype(jnp.float32)], axis=1)
    act = jnp.pad(act, ((0, 0), (0, ACT_WIDTH - act.shape[1])))

    vmem = pl.BlockSpec(memory_space=pltpu.MemorySpace.VMEM)
    packed = pl.pallas_call(
        _vae_gmm_fused_kernel,
        out_shape=jax.ShapeDtypeStruct((batch, OUT_WIDTH), jnp.float32),
        in_specs=[vmem, vmem],
        out_specs=vmem,
    )(act, p_slab)

    x_recon = packed[:, O_XR:O_XR + INPUT_DIM]
    mu = packed[:, O_MU:O_MU + LATENT_DIM]
    logvar = packed[:, O_LV:O_LV + LATENT_DIM]
    z = packed[:, O_Z:O_Z + LATENT_DIM]
    gamma = packed[:, O_G:O_G + N_COMPONENTS]
    return x_recon, mu, logvar, z, gamma


# ---------------------------------------------------------------------------
# Deterministic parameter construction (synthetic init, not a checkpoint)
# ---------------------------------------------------------------------------
def build_params(key):
    keys = iter(jax.random.split(key, 32))

    def lin(i_dim, o_dim):
        w = jax.random.normal(next(keys), (i_dim, o_dim), jnp.float32) / jnp.sqrt(
            jnp.float32(i_dim))
        b = jnp.zeros((1, o_dim), jnp.float32)
        return w, b

    enc = []
    prev = INPUT_DIM
    for d in HIDDEN_DIMS:
        w, b = lin(prev, d)
        enc.append((w, b, jnp.ones((1, d), jnp.float32), jnp.zeros((1, d), jnp.float32)))
        prev = d
    w_mu, b_mu = lin(prev, LATENT_DIM)
    w_lv, b_lv = lin(prev, LATENT_DIM)
    dec = []
    prev = LATENT_DIM
    for d in reversed(HIDDEN_DIMS):
        w, b = lin(prev, d)
        dec.append((w, b, jnp.ones((1, d), jnp.float32), jnp.zeros((1, d), jnp.float32)))
        prev = d
    w_out, b_out = lin(prev, INPUT_DIM)

    gmm_log_w = jnp.zeros((1, N_COMPONENTS), jnp.float32)
    gmm_means = jax.random.normal(next(keys), (N_COMPONENTS, LATENT_DIM), jnp.float32)
    gmm_log_covs = jnp.zeros((N_COMPONENTS, LATENT_DIM), jnp.float32)
    return dict(enc=enc, mu=(w_mu, b_mu), lv=(w_lv, b_lv), dec=dec,
                out=(w_out, b_out), gmm=(gmm_log_w, gmm_means, gmm_log_covs))


def pack_params(p):
    """Pack ALL parameters into one row-major (P_ROWS, W_COLS) slab.

    Done ONCE host-side, so the hoisted GMM math here is free per kernel call.
    """
    rows = []

    def add_mat(m):
        m = jnp.asarray(m, jnp.float32)
        rows.append(jnp.pad(m, ((0, 0), (0, W_COLS - m.shape[1]))))

    def add_vec(v):
        v = jnp.asarray(v, jnp.float32).reshape(1, -1)
        rows.append(jnp.pad(v, ((0, 0), (0, W_COLS - v.shape[1]))))

    for (w, b, g, bt) in p["enc"]:
        add_mat(w); add_vec(b); add_vec(g); add_vec(bt)

    # fused fc_mu | fc_logvar
    add_mat(jnp.concatenate([p["mu"][0], p["lv"][0]], axis=1))
    add_vec(jnp.concatenate([p["mu"][1], p["lv"][1]], axis=1))

    for (w, b, g, bt) in p["dec"]:
        add_mat(w); add_vec(b); add_vec(g); add_vec(bt)

    add_mat(p["out"][0]); add_vec(p["out"][1])

    # ---- hoisted parameter-only GMM math -> (2D, C) matrix + (1, C) const ----
    log_w, means, log_covs = p["gmm"]
    covs = jax.nn.softplus(log_covs)                     # (C, D)
    inv_cov = 1.0 / covs
    log_pi = jax.nn.log_softmax(log_w, axis=1)           # (1, C)
    a_quad = -0.5 * inv_cov.T                            # (D, C): multiplies z*z
    a_lin = (means * inv_cov).T                          # (D, C): multiplies z
    log_det = jnp.sum(jnp.log(2.0 * jnp.pi * covs), axis=1)        # (C,)
    mdm = jnp.sum(means * means * inv_cov, axis=1)                 # (C,)
    a_const = (-0.5 * (log_det + mdm))[None, :] + log_pi           # (1, C)
    add_mat(jnp.concatenate([a_quad, a_lin], axis=0))
    add_vec(a_const)

    slab = jnp.concatenate(rows, axis=0)
    assert slab.shape == (P_ROWS_USED, W_COLS), slab.shape
    slab = jnp.pad(slab, ((0, P_ROWS - P_ROWS_USED), (0, 0)))
    return slab


# ---------------------------------------------------------------------------
# Pure-JAX reference (for a correctness check of the fused kernel)
# ---------------------------------------------------------------------------
def reference_forward(x, eps, p):
    hi = jax.lax.Precision.HIGHEST

    def bn(h, g, bt):
        m = jnp.mean(h, axis=0, keepdims=True)
        v = jnp.mean((h - m) ** 2, axis=0, keepdims=True)
        return (h - m) / jnp.sqrt(v + BN_EPS) * g + bt

    h = x
    for (w, b, g, bt) in p["enc"]:
        h = bn(jnp.maximum(jnp.dot(h, w, precision=hi) + b, 0.0), g, bt)
    mu = jnp.dot(h, p["mu"][0], precision=hi) + p["mu"][1]
    logvar = jnp.dot(h, p["lv"][0], precision=hi) + p["lv"][1]
    z = mu + eps * jnp.exp(0.5 * logvar)
    hd = z
    for (w, b, g, bt) in p["dec"]:
        hd = bn(jnp.maximum(jnp.dot(hd, w, precision=hi) + b, 0.0), g, bt)
    x_recon = jnp.dot(hd, p["out"][0], precision=hi) + p["out"][1]

    log_w, means, log_covs = p["gmm"]
    covs = jax.nn.softplus(log_covs)
    log_pi = jax.nn.log_softmax(log_w, axis=1)
    diff = z[:, None, :] - means[None, :, :]
    log_p = -0.5 * (jnp.sum(jnp.log(2.0 * jnp.pi * covs), axis=1)[None, :]
                    + jnp.sum(diff * diff / covs[None, :, :], axis=2)) + log_pi
    gamma = jax.nn.softmax(log_p, axis=1)
    return x_recon, mu, logvar, z, gamma


if __name__ == "__main__":
    root = jax.random.PRNGKey(0)
    k_params, k_x, k_eps = jax.random.split(root, 3)

    params = build_params(k_params)
    p_slab = pack_params(params)
    x = jax.random.normal(k_x, (BATCH, INPUT_DIM), jnp.float32)
    eps = jax.random.normal(k_eps, (BATCH, LATENT_DIM), jnp.float32)

    outs = vae_gmm_forward_with_gamma(x, eps, p_slab)
    jax.block_until_ready(outs)
    x_recon, mu, logvar, z, gamma = outs

    assert x_recon.shape == (BATCH, INPUT_DIM)
    assert mu.shape == (BATCH, LATENT_DIM)
    assert logvar.shape == (BATCH, LATENT_DIM)
    assert z.shape == (BATCH, LATENT_DIM)
    assert gamma.shape == (BATCH, N_COMPONENTS)

    # responsibilities must sum to 1 over components
    assert bool(jnp.allclose(jnp.sum(gamma, axis=1), 1.0, atol=1e-5))

    # check against a pure-JAX reference of the same forward pass
    refs = reference_forward(x, eps, params)
    names = ["x_recon", "mu", "logvar", "z", "gamma"]
    for name, got, want in zip(names, outs, refs):
        assert got.shape == want.shape, name
        assert bool(jnp.allclose(got, want, rtol=2e-2, atol=2e-2)), name

    # TODO(synk): BatchNorm eval path (running stats) and in-kernel eps sampling
    # (torch.randn_like) are not implemented; training-mode batch stats are used
    # and eps is supplied as an input. A batch grid (v7x 2-TC sharding) would
    # require a cross-tile BN-stats pass, so the kernel stays grid-less here.
    print("KERNEL_OK")
</pallas_src>

<mosaic_0001>
module attributes {stable_mosaic.version = 11 : i64} {
  func.func @_vae_gmm_fused_kernel(%arg0: memref<8x128xf32, #tpu.memory_space<vmem>>, %arg1: memref<184x32xf32, #tpu.memory_space<vmem>>, %arg2: memref<8x128xf32, #tpu.memory_space<vmem>>) attributes {dimension_semantics = [], scalar_prefetch = 0 : i64, scratch_operands = 0 : i64, tpu.core_type = #tpu.core_type<tc>} {
    %c0 = arith.constant 0 : index
    %c0_0 = arith.constant 0 : index
    %0 = vector.load %arg0[%c0, %c0_0] : memref<8x128xf32, #tpu.memory_space<vmem>>, vector<8x16xf32>
    %c0_1 = arith.constant 0 : index
    %c16 = arith.constant 16 : index
    %1 = vector.load %arg0[%c0_1, %c16] : memref<8x128xf32, #tpu.memory_space<vmem>>, vector<8x8xf32>
    %c0_2 = arith.constant 0 : index
    %c0_3 = arith.constant 0 : index
    %2 = vector.load %arg1[%c0_2, %c0_3] : memref<184x32xf32, #tpu.memory_space<vmem>>, vector<16x32xf32>
    %c16_4 = arith.constant 16 : index
    %c0_5 = arith.constant 0 : index
    %3 = vector.load %arg1[%c16_4, %c0_5] : memref<184x32xf32, #tpu.memory_space<vmem>>, vector<1x32xf32>
    %c17 = arith.constant 17 : index
    %c0_6 = arith.constant 0 : index
    %4 = vector.load %arg1[%c17, %c0_6] : memref<184x32xf32, #tpu.memory_space<vmem>>, vector<1x32xf32>
    %c18 = arith.constant 18 : index
    %c0_7 = arith.constant 0 : index
    %5 = vector.load %arg1[%c18, %c0_7] : memref<184x32xf32, #tpu.memory_space<vmem>>, vector<1x32xf32>
    %cst = arith.constant dense<0.000000e+00> : vector<8x32xf32>
    %6 = tpu.matmul %0, %2, %cst {dimension_numbers = #tpu.dot_dimension_numbers<[1], [0], [0], [1], [0, 0, 1, 1], [], []>} : vector<8x16xf32>, vector<16x32xf32>, vector<8x32xf32> -> vector<8x32xf32>
    %7 = vector.broadcast %3 : vector<1x32xf32> to vector<8x32xf32>
    %8 = arith.addf %6, %7 : vector<8x32xf32>
    %cst_8 = arith.constant 0.000000e+00 : f32
    %9 = vector.broadcast %cst_8 : f32 to vector<8x32xf32>
    %10 = arith.maximumf %8, %9 : vector<8x32xf32>
    %cst_9 = arith.constant dense<0.000000e+00> : vector<32xf32>
    %11 = vector.multi_reduction <add>, %10, %cst_9 [0] : vector<8x32xf32> to vector<32xf32>
    %12 = vector.shape_cast %11 : vector<32xf32> to vector<1x32xf32>
    %cst_10 = arith.constant 1.250000e-01 : f32
    %13 = vector.broadcast %cst_10 : f32 to vector<1x32xf32>
    %14 = arith.mulf %12, %13 : vector<1x32xf32>
    %15 = arith.mulf %10, %10 : vector<8x32xf32>
    %cst_11 = arith.constant dense<0.000000e+00> : vector<32xf32>
    %16 = vector.multi_reduction <add>, %15, %cst_11 [0] : vector<8x32xf32> to vector<32xf32>
    %17 = vector.shape_cast %16 : vector<32xf32> to vector<1x32xf32>
    %cst_12 = arith.constant 1.250000e-01 : f32
    %18 = vector.broadcast %cst_12 : f32 to vector<1x32xf32>
    %19 = arith.mulf %17, %18 : vector<1x32xf32>
    %20 = arith.mulf %14, %14 : vector<1x32xf32>
    %21 = arith.subf %19, %20 : vector<1x32xf32>
    %cst_13 = arith.constant 0.000000e+00 : f32
    %22 = vector.broadcast %cst_13 : f32 to vector<1x32xf32>
    %23 = arith.maximumf %21, %22 : vector<1x32xf32>
    %24 = vector.broadcast %14 : vector<1x32xf32> to vector<8x32xf32>
    %25 = arith.subf %10, %24 : vector<8x32xf32>
    %cst_14 = arith.constant 9.99999974E-6 : f32
    %26 = vector.broadcast %cst_14 : f32 to vector<1x32xf32>
    %27 = arith.addf %23, %26 : vector<1x32xf32>
    %28 = math.rsqrt %27 : vector<1x32xf32>
    %29 = vector.broadcast %28 : vector<1x32xf32> to vector<8x32xf32>
    %30 = arith.mulf %25, %29 : vector<8x32xf32>
    %31 = vector.broadcast %4 : vector<1x32xf32> to vector<8x32xf32>
    %32 = arith.mulf %30, %31 : vector<8x32xf32>
    %33 = vector.broadcast %5 : vector<1x32xf32> to vector<8x32xf32>
    %34 = arith.addf %32, %33 : vector<8x32xf32>
    %c19 = arith.constant 19 : index
    %c0_15 = arith.constant 0 : index
    %35 = vector.load %arg1[%c19, %c0_15] : memref<184x32xf32, #tpu.memory_space<vmem>>, vector<32x32xf32>
    %c51 = arith.constant 51 : index
    %c0_16 = arith.constant 0 : index
    %36 = vector.load %arg1[%c51, %c0_16] : memref<184x32xf32, #tpu.memory_space<vmem>>, vector<1x32xf32>
    %c52 = arith.constant 52 : index
    %c0_17 = arith.constant 0 : index
    %37 = vector.load %arg1[%c52, %c0_17] : memref<184x32xf32, #tpu.memory_space<vmem>>, vector<1x32xf32>
    %c53 = arith.constant 53 : index
    %c0_18 = arith.constant 0 : index
    %38 = vector.load %arg1[%c53, %c0_18] : memref<184x32xf32, #tpu.memory_space<vmem>>, vector<1x32xf32>
    %cst_19 = arith.constant dense<0.000000e+00> : vector<8x32xf32>
    %39 = tpu.matmul %34, %35, %cst_19 {dimension_numbers = #tpu.dot_dimension_numbers<[1], [0], [0], [1], [0, 0, 1, 1], [], []>} : vector<8x32xf32>, vector<32x32xf32>, vector<8x32xf32> -> vector<8x32xf32>
    %40 = vector.broadcast %36 : vector<1x32xf32> to vector<8x32xf32>
    %41 = arith.addf %39, %40 : vector<8x32xf32>
    %cst_20 = arith.constant 0.000000e+00 : f32
    %42 = vector.broadcast %cst_20 : f32 to vector<8x32xf32>
    %43 = arith.maximumf %41, %42 : vector<8x32xf32>
    %cst_21 = arith.constant dense<0.000000e+00> : vector<32xf32>
    %44 = vector.multi_reduction <add>, %43, %cst_21 [0] : vector<8x32xf32> to vector<32xf32>
    %45 = vector.shape_cast %44 : vector<32xf32> to vector<1x32xf32>
    %cst_22 = arith.constant 1.250000e-01 : f32
    %46 = vector.broadcast %cst_22 : f32 to vector<1x32xf32>
    %47 = arith.mulf %45, %46 : vector<1x32xf32>
    %48 = arith.mulf %43, %43 : vector<8x32xf32>
    %cst_23 = arith.constant dense<0.000000e+00> : vector<32xf32>
    %49 = vector.multi_reduction <add>, %48, %cst_23 [0] : vector<8x32xf32> to vector<32xf32>
    %50 = vector.shape_cast %49 : vector<32xf32> to vector<1x32xf32>
    %cst_24 = arith.constant 1.250000e-01 : f32
    %51 = vector.broadcast %cst_24 : f32 to vector<1x32xf32>
    %52 = arith.mulf %50, %51 : vector<1x32xf32>
    %53 = arith.mulf %47, %47 : vector<1x32xf32>
    %54 = arith.subf %52, %53 : vector<1x32xf32>
    %cst_25 = arith.constant 0.000000e+00 : f32
    %55 = vector.broadcast %cst_25 : f32 to vector<1x32xf32>
    %56 = arith.maximumf %54, %55 : vector<1x32xf32>
    %57 = vector.broadcast %47 : vector<1x32xf32> to vector<8x32xf32>
    %58 = arith.subf %43, %57 : vector<8x32xf32>
    %cst_26 = arith.constant 9.99999974E-6 : f32
    %59 = vector.broadcast %cst_26 : f32 to vector<1x32xf32>
    %60 = arith.addf %56, %59 : vector<1x32xf32>
    %61 = math.rsqrt %60 : vector<1x32xf32>
    %62 = vector.broadcast %61 : vector<1x32xf32> to vector<8x32xf32>
    %63 = arith.mulf %58, %62 : vector<8x32xf32>
    %64 = vector.broadcast %37 : vector<1x32xf32> to vector<8x32xf32>
    %65 = arith.mulf %63, %64 : vector<8x32xf32>
    %66 = vector.broadcast %38 : vector<1x32xf32> to vector<8x32xf32>
    %67 = arith.addf %65, %66 : vector<8x32xf32>
    %c54 = arith.constant 54 : index
    %c0_27 = arith.constant 0 : index
    %68 = vector.load %arg1[%c54, %c0_27] : memref<184x32xf32, #tpu.memory_space<vmem>>, vector<32x16xf32>
    %c86 = arith.constant 86 : index
    %c0_28 = arith.constant 0 : index
    %69 = vector.load %arg1[%c86, %c0_28] : memref<184x32xf32, #tpu.memory_space<vmem>>, vector<1x16xf32>
    %cst_29 = arith.constant dense<0.000000e+00> : vector<8x16xf32>
    %70 = tpu.matmul %67, %68, %cst_29 {dimension_numbers = #tpu.dot_dimension_numbers<[1], [0], [0], [1], [0, 0, 1, 1], [], []>} : vector<8x32xf32>, vector<32x16xf32>, vector<8x16xf32> -> vector<8x16xf32>
    %71 = vector.broadcast %69 : vector<1x16xf32> to vector<8x16xf32>
    %72 = arith.addf %70, %71 : vector<8x16xf32>
    %73 = vector.extract_strided_slice %72 {offsets = [0, 0], sizes = [8, 8], strides = [1, 1]} : vector<8x16xf32> to vector<8x8xf32>
    %74 = vector.extract_strided_slice %72 {offsets = [0, 8], sizes = [8, 8], strides = [1, 1]} : vector<8x16xf32> to vector<8x8xf32>
    %cst_30 = arith.constant 5.000000e-01 : f32
    %75 = vector.broadcast %cst_30 : f32 to vector<8x8xf32>
    %76 = arith.mulf %75, %74 : vector<8x8xf32>
    %77 = math.exp %76 : vector<8x8xf32>
    %78 = arith.mulf %1, %77 : vector<8x8xf32>
    %79 = arith.addf %73, %78 : vector<8x8xf32>
    %c87 = arith.constant 87 : index
    %c0_31 = arith.constant 0 : index
    %80 = vector.load %arg1[%c87, %c0_31] : memref<184x32xf32, #tpu.memory_space<vmem>>, vector<8x32xf32>
    %c95 = arith.constant 95 : index
    %c0_32 = arith.constant 0 : index
    %81 = vector.load %arg1[%c95, %c0_32] : memref<184x32xf32, #tpu.memory_space<vmem>>, vector<1x32xf32>
    %c96 = arith.constant 96 : index
    %c0_33 = arith.constant 0 : index
    %82 = vector.load %arg1[%c96, %c0_33] : memref<184x32xf32, #tpu.memory_space<vmem>>, vector<1x32xf32>
    %c97 = arith.constant 97 : index
    %c0_34 = arith.constant 0 : index
    %83 = vector.load %arg1[%c97, %c0_34] : memref<184x32xf32, #tpu.memory_space<vmem>>, vector<1x32xf32>
    %cst_35 = arith.constant dense<0.000000e+00> : vector<8x32xf32>
    %84 = tpu.matmul %79, %80, %cst_35 {dimension_numbers = #tpu.dot_dimension_numbers<[1], [0], [0], [1], [0, 0, 1, 1], [], []>} : vector<8x8xf32>, vector<8x32xf32>, vector<8x32xf32> -> vector<8x32xf32>
    %85 = vector.broadcast %81 : vector<1x32xf32> to vector<8x32xf32>
    %86 = arith.addf %84, %85 : vector<8x32xf32>
    %cst_36 = arith.constant 0.000000e+00 : f32
    %87 = vector.broadcast %cst_36 : f32 to vector<8x32xf32>
    %88 = arith.maximumf %86, %87 : vector<8x32xf32>
    %cst_37 = arith.constant dense<0.000000e+00> : vector<32xf32>
    %89 = vector.multi_reduction <add>, %88, %cst_37 [0] : vector<8x32xf32> to vector<32xf32>
    %90 = vector.shape_cast %89 : vector<32xf32> to vector<1x32xf32>
    %cst_38 = arith.constant 1.250000e-01 : f32
    %91 = vector.broadcast %cst_38 : f32 to vector<1x32xf32>
    %92 = arith.mulf %90, %91 : vector<1x32xf32>
    %93 = arith.mulf %88, %88 : vector<8x32xf32>
    %cst_39 = arith.constant dense<0.000000e+00> : vector<32xf32>
    %94 = vector.multi_reduction <add>, %93, %cst_39 [0] : vector<8x32xf32> to vector<32xf32>
    %95 = vector.shape_cast %94 : vector<32xf32> to vector<1x32xf32>
    %cst_40 = arith.constant 1.250000e-01 : f32
    %96 = vector.broadcast %cst_40 : f32 to vector<1x32xf32>
    %97 = arith.mulf %95, %96 : vector<1x32xf32>
    %98 = arith.mulf %92, %92 : vector<1x32xf32>
    %99 = arith.subf %97, %98 : vector<1x32xf32>
    %cst_41 = arith.constant 0.000000e+00 : f32
    %100 = vector.broadcast %cst_41 : f32 to vector<1x32xf32>
    %101 = arith.maximumf %99, %100 : vector<1x32xf32>
    %102 = vector.broadcast %92 : vector<1x32xf32> to vector<8x32xf32>
    %103 = arith.subf %88, %102 : vector<8x32xf32>
    %cst_42 = arith.constant 9.99999974E-6 : f32
    %104 = vector.broadcast %cst_42 : f32 to vector<1x32xf32>
    %105 = arith.addf %101, %104 : vector<1x32xf32>
    %106 = math.rsqrt %105 : vector<1x32xf32>
    %107 = vector.broadcast %106 : vector<1x32xf32> to vector<8x32xf32>
    %108 = arith.mulf %103, %107 : vector<8x32xf32>
    %109 = vector.broadcast %82 : vector<1x32xf32> to vector<8x32xf32>
    %110 = arith.mulf %108, %109 : vector<8x32xf32>
    %111 = vector.broadcast %83 : vector<1x32xf32> to vector<8x32xf32>
    %112 = arith.addf %110, %111 : vector<8x32xf32>
    %c98 = arith.constant 98 : index
    %c0_43 = arith.constant 0 : index
    %113 = vector.load %arg1[%c98, %c0_43] : memref<184x32xf32, #tpu.memory_space<vmem>>, vector<32x32xf32>
    %c130 = arith.constant 130 : index
    %c0_44 = arith.constant 0 : index
    %114 = vector.load %arg1[%c130, %c0_44] : memref<184x32xf32, #tpu.memory_space<vmem>>, vector<1x32xf32>
    %c131 = arith.constant 131 : index
    %c0_45 = arith.constant 0 : index
    %115 = vector.load %arg1[%c131, %c0_45] : memref<184x32xf32, #tpu.memory_space<vmem>>, vector<1x32xf32>
    %c132 = arith.constant 132 : index
    %c0_46 = arith.constant 0 : index
    %116 = vector.load %arg1[%c132, %c0_46] : memref<184x32xf32, #tpu.memory_space<vmem>>, vector<1x32xf32>
    %cst_47 = arith.constant dense<0.000000e+00> : vector<8x32xf32>
    %117 = tpu.matmul %112, %113, %cst_47 {dimension_numbers = #tpu.dot_dimension_numbers<[1], [0], [0], [1], [0, 0, 1, 1], [], []>} : vector<8x32xf32>, vector<32x32xf32>, vector<8x32xf32> -> vector<8x32xf32>
    %118 = vector.broadcast %114 : vector<1x32xf32> to vector<8x32xf32>
    %119 = arith.addf %117, %118 : vector<8x32xf32>
    %cst_48 = arith.constant 0.000000e+00 : f32
    %120 = vector.broadcast %cst_48 : f32 to vector<8x32xf32>
    %121 = arith.maximumf %119, %120 : vector<8x32xf32>
    %cst_49 = arith.constant dense<0.000000e+00> : vector<32xf32>
    %122 = vector.multi_reduction <add>, %121, %cst_49 [0] : vector<8x32xf32> to vector<32xf32>
    %123 = vector.shape_cast %122 : vector<32xf32> to vector<1x32xf32>
    %cst_50 = arith.constant 1.250000e-01 : f32
    %124 = vector.broadcast %cst_50 : f32 to vector<1x32xf32>
    %125 = arith.mulf %123, %124 : vector<1x32xf32>
    %126 = arith.mulf %121, %121 : vector<8x32xf32>
    %cst_51 = arith.constant dense<0.000000e+00> : vector<32xf32>
    %127 = vector.multi_reduction <add>, %126, %cst_51 [0] : vector<8x32xf32> to vector<32xf32>
    %128 = vector.shape_cast %127 : vector<32xf32> to vector<1x32xf32>
    %cst_52 = arith.constant 1.250000e-01 : f32
    %129 = vector.broadcast %cst_52 : f32 to vector<1x32xf32>
    %130 = arith.mulf %128, %129 : vector<1x32xf32>
    %131 = arith.mulf %125, %125 : vector<1x32xf32>
    %132 = arith.subf %130, %131 : vector<1x32xf32>
    %cst_53 = arith.constant 0.000000e+00 : f32
    %133 = vector.broadcast %cst_53 : f32 to vector<1x32xf32>
    %134 = arith.maximumf %132, %133 : vector<1x32xf32>
    %135 = vector.broadcast %125 : vector<1x32xf32> to vector<8x32xf32>
    %136 = arith.subf %121, %135 : vector<8x32xf32>
    %cst_54 = arith.constant 9.99999974E-6 : f32
    %137 = vector.broadcast %cst_54 : f32 to vector<1x32xf32>
    %138 = arith.addf %134, %137 : vector<1x32xf32>
    %139 = math.rsqrt %138 : vector<1x32xf32>
    %140 = vector.broadcast %139 : vector<1x32xf32> to vector<8x32xf32>
    %141 = arith.mulf %136, %140 : vector<8x32xf32>
    %142 = vector.broadcast %115 : vector<1x32xf32> to vector<8x32xf32>
    %143 = arith.mulf %141, %142 : vector<8x32xf32>
    %144 = vector.broadcast %116 : vector<1x32xf32> to vector<8x32xf32>
    %145 = arith.addf %143, %144 : vector<8x32xf32>
    %c133 = arith.constant 133 : index
    %c0_55 = arith.constant 0 : index
    %146 = vector.load %arg1[%c133, %c0_55] : memref<184x32xf32, #tpu.memory_space<vmem>>, vector<32x16xf32>
    %c165 = arith.constant 165 : index
    %c0_56 = arith.constant 0 : index
    %147 = vector.load %arg1[%c165, %c0_56] : memref<184x32xf32, #tpu.memory_space<vmem>>, vector<1x16xf32>
    %cst_57 = arith.constant dense<0.000000e+00> : vector<8x16xf32>
    %148 = tpu.matmul %145, %146, %cst_57 {dimension_numbers = #tpu.dot_dimension_numbers<[1], [0], [0], [1], [0, 0, 1, 1], [], []>} : vector<8x32xf32>, vector<32x16xf32>, vector<8x16xf32> -> vector<8x16xf32>
    %149 = vector.broadcast %147 : vector<1x16xf32> to vector<8x16xf32>
    %150 = arith.addf %148, %149 : vector<8x16xf32>
    %c166 = arith.constant 166 : index
    %c0_58 = arith.constant 0 : index
    %151 = vector.load %arg1[%c166, %c0_58] : memref<184x32xf32, #tpu.memory_space<vmem>>, vector<16x4xf32>
    %c182 = arith.constant 182 : index
    %c0_59 = arith.constant 0 : index
    %152 = vector.load %arg1[%c182, %c0_59] : memref<184x32xf32, #tpu.memory_space<vmem>>, vector<1x4xf32>
    %153 = arith.mulf %79, %79 : vector<8x8xf32>
    %154 = tpu.concatenate %153, %79 in 1 : vector<8x8xf32>, vector<8x8xf32> -> vector<8x16xf32>
    %cst_60 = arith.constant dense<0.000000e+00> : vector<8x4xf32>
    %155 = tpu.matmul %154, %151, %cst_60 {dimension_numbers = #tpu.dot_dimension_numbers<[1], [0], [0], [1], [0, 0, 1, 1], [], []>} : vector<8x16xf32>, vector<16x4xf32>, vector<8x4xf32> -> vector<8x4xf32>
    %156 = vector.broadcast %152 : vector<1x4xf32> to vector<8x4xf32>
    %157 = arith.addf %155, %156 : vector<8x4xf32>
    %cst_61 = arith.constant dense<0xFF800000> : vector<8xf32>
    %158 = vector.multi_reduction <maximumf>, %157, %cst_61 [1] : vector<8x4xf32> to vector<8xf32>
    %cst_62 = arith.constant 0xFF800000 : f32
    %159 = vector.broadcast %cst_62 : f32 to vector<8xf32>
    %160 = arith.maximumf %159, %158 : vector<8xf32>
    %161 = vector.shape_cast %160 : vector<8xf32> to vector<8x1xf32>
    %162 = tpu.weird %161 : vector<8x1xf32> -> vector<8x1xi1>
    %cst_63 = arith.constant dense<true> : vector<8x1xi1>
    %163 = arith.xori %162, %cst_63 : vector<8x1xi1>
    %cst_64 = arith.constant 0.000000e+00 : f32
    %164 = vector.broadcast %cst_64 : f32 to vector<8x1xf32>
    %165 = arith.select %163, %161, %164 : vector<8x1xi1>, vector<8x1xf32>
    %166 = vector.broadcast %165 : vector<8x1xf32> to vector<8x4xf32>
    %167 = arith.subf %157, %166 : vector<8x4xf32>
    %168 = math.exp %167 : vector<8x4xf32>
    %cst_65 = arith.constant dense<0.000000e+00> : vector<8xf32>
    %169 = vector.multi_reduction <add>, %168, %cst_65 [1] : vector<8x4xf32> to vector<8xf32>
    %170 = vector.shape_cast %169 : vector<8xf32> to vector<8x1xf32>
    %171 = math.absf %170 : vector<8x1xf32>
    %172 = math.log %171 : vector<8x1xf32>
    %173 = arith.addf %172, %165 : vector<8x1xf32>
    %174 = vector.broadcast %173 : vector<8x1xf32> to vector<8x4xf32>
    %175 = arith.subf %157, %174 : vector<8x4xf32>
    %176 = math.exp %175 : vector<8x4xf32>
    %cst_66 = arith.constant 0.000000e+00 : f32
    %177 = vector.broadcast %cst_66 : f32 to vector<8x84xf32>
    %178 = tpu.concatenate %150, %73, %74, %79, %176, %177 in 1 : vector<8x16xf32>, vector<8x8xf32>, vector<8x8xf32>, vector<8x8xf32>, vector<8x4xf32>, vector<8x84xf32> -> vector<8x128xf32>
    %c0_67 = arith.constant 0 : index
    %c0_68 = arith.constant 0 : index
    %179 = vector.load %arg2[%c0_67, %c0_68] : memref<8x128xf32, #tpu.memory_space<vmem>>, vector<8x128xf32>
    tpu.vector_store %arg2[%c0_67, %c0_68], %178 {strides = array<i32>} : memref<8x128xf32, #tpu.memory_space<vmem>>, vector<8x128xf32>,
    return
  }
}

</mosaic_0001>

<bundles_post_ra>
// kernel: vae_gmm_forward_with_gamma.1
= control target key start
LH: loop header
LB: loop body
LE: loop exit
PB: predicated region body
PF: predicated region fallthrough
CT: control target
= control target key end

     0   :  { %v960_v0 = vmov 0.0|0.0   ;;  %vm961_vm0 = vmmov 0   ;;  %v962_v3 = vmov 0.0   ;;  %vm21_vm1 = vcmask 130048   ;;  %s963_s18 = smov 8   ;;  %s965_s20 = smov 32   ;;  %s1159_s1 = inlined_call_operand.vmem [shape: f32[184,32], index: 1, kind: input, shape index: {}]   ;;  %s1160_s0 = inlined_call_operand.vmem [shape: f32[8,128], index: 0, kind: input, shape index: {}]   ;;  %s1161_s2 = inlined_call_operand.vmem [shape: f32[8,128], index: 2, kind: output, shape index: {}]  }
   0x1   :  { %905 = vmatprep.subr.bf16.mxu0 %v960_v0  ;;  %v12_v1 = vld [vmem:[%s1159_s1] sm:$0xff]  ;;  %v13_v2 = vld [vmem:[%s1159_s1 + $0x8] sm:$0xff]  ;;  %846 = vmatprep.mubr.msk.f32.mxu0 %vm961_vm0, %v962_v3  ;;  %v131_v6 = vld [vmem:[%s1159_s1 + $0x13] sm:$0xff]  ;;  %vm96_vm2 = vcmask 261120   ;;  %vm353_vm3 = vcmask 64512   ;;  %vm748_vm4 = vcmask 31744  }
   0x2   :  { %v906_v4 = vpack.c.bf16 %v13_v2, %v12_v1  ;;  %908 = vmatprep.subr.bf16.mxu1 %v960_v0  ;;  %857 = vmatprep.mubr.msk.f32.mxu1 %vm961_vm0, %v962_v3  ;;  %v999_v5 = vld [vmem:[%s1160_s0] sm:$0xff]  ;;  %v134_v10 = vld [vmem:[%s1159_s1 + $0x2b] sm:$0xff]  ;;  %v250_v45 = vld [vmem:[%s1159_s1 + $0x36] sm:$0xff]  ;;  %s964_s0 = smov 112   ;;  %vm966_vm6 = vmmov 1   ;;  %s967_s25 = smov 16  }
   0x3   :  { %v132_v7 = vld [vmem:[%s1159_s1 + $0x1b] sm:$0xff]  ;;  %v133_v9 = vld [vmem:[%s1159_s1 + $0x23] sm:$0xff]  ;;  %v792_v12 = vld [vmem:[%s1159_s1 + $0x10] ss:$0 sm:$0xff]  ;;  %s968_s26 = smov 40   ;;  %vm780_vm8 = vcmask 195584  }
   0x4   :  { %907 = vmatpush3.bf16.msra.mxu0 %v906_v4  ;;  %v909_v8 = vpack.c.bf16 %v132_v7, %v131_v6  ;;  %v912_v11 = vpack.c.bf16 %v134_v10, %v133_v9  ;;  %v794_v40 = vld [vmem:[%s1159_s1 + $0x11] ss:$0 sm:$0xff]  ;;  %v795_v42 = vld [vmem:[%s1159_s1 + $0x12] ss:$0 sm:$0xff]  ;;  %v251_v46 = vld [vmem:[%s1159_s1 + $0x3e] sm:$0xff]  ;;  %vm783_vm9 = vcmask 326656  }
   0x5   :  { %914 = vmatprep.subr.bf16.mxu0 %v960_v0  ;;  %v915_v47 = vpack.c.bf16 %v251_v46, %v250_v45  ;;  %v252_v48 = vld [vmem:[%s1159_s1 + $0x46] sm:$0xff]  ;;  %v253_v49 = vld [vmem:[%s1159_s1 + $0x4e] sm:$0xff]  ;;  %vm785_vm10 = vcmask 359424  }
   0x6   :  { %910 = vmatpush3.bf16.msra.mxu1 %v909_v8  ;;  %v918_v50 = vpack.c.bf16 %v253_v49, %v252_v48  ;;  %v796_v51 = vld [vmem:[%s1159_s1 + $0x33] ss:$0 sm:$0xff] }
   0x7   :  { %847 = vmatmul.mubr.msk.f32.vlgmr.msra.gmra.mrb[0].mxu0 %vm21_vm1, %v999_v5  ;;  %911 = vmatprep.subr.bf16.mxu1 %v960_v0 }
   0x8   :  { %868 = vmatprep.mubr.msk.f32.mxu0 %vm961_vm0, %v962_v3  ;;  %916 = vmatpush3.bf16.msra.mxu0 %v915_v47 }
   0x9   :  { %917 = vmatprep.subr.bf16.mxu0 %v960_v0 }
   0xa   :  { %913 = vmatpush3.bf16.msra.mxu1 %v912_v11 }
   0xb   :  { %871 = vmatprep.subr.mxu1 %v962_v3 }
   0xc   :  { %919 = vmatpush3.bf16.msra.mxu0 %v918_v50 }
   0xd   :  { %920 = vmatprep.subr.bf16.mxu0 %v960_v0 }
  0xda   :  { %v91_v13 = vpop.f32.mrb[0].mxu0 }
  0xdb   :  { %v92_v14 = vadd.f32 %v792_v12, %v91_v13  ;;  %v848_v15 = vpop.f32.mrb[1].mxu0 }
  0xdd   :  { %v95_v16 = vmax.f32 %v92_v14, 0.0 }
  0xdf   :  { %v97_v17 = vsel %vm96_vm2, %v95_v16, 0.0  ;;  %v105_v18 = vmul.f32 %v95_v16, %v95_v16 }
  0xe0   :  { %v98_v19 = vrot.slane %v97_v17, 4 }
  0xe1   :  { %v106_v20 = vsel %vm96_vm2, %v105_v18, 0.0  ;;  %v798_v18 = vld [vmem:[%s1159_s1 + $0x34] ss:$0 sm:$0xff] }
  0xe2   :  { %v99_v21 = vadd.f32 %v98_v19, %v97_v17  ;;  %v107_v22 = vrot.slane %v106_v20, 4 }
  0xe4   :  { %v100_v23 = vrot.slane %v99_v21, 2  ;;  %v108_v24 = vadd.f32 %v107_v22, %v106_v20  ;;  %v799_v20 = vld [vmem:[%s1159_s1 + $0x35] ss:$0 sm:$0xff] }
  0xe6   :  { %v101_v25 = vadd.f32 %v100_v23, %v99_v21  ;;  %v109_v26 = vrot.slane %v108_v24, 2  ;;  %v800_v23 = vld [vmem:[%s1159_s1 + $0x56] ss:$0 sm:$0xff] }
  0xe8   :  { %v102_v27 = vrot.slane %v101_v25, 1  ;;  %v110_v28 = vadd.f32 %v109_v26, %v108_v24 }
  0xea   :  { %v103_v29 = vadd.f32 %v102_v27, %v101_v25  ;;  %v111_v30 = vrot.slane %v110_v28, 1 }
  0xec   :  { %v104_v31 = vmul.f32 0.125, %v103_v29  ;;  %v112_v32 = vadd.f32 %v111_v30, %v110_v28  ;;  %v345_v29 = vld [vmem:[%s1159_s1 + $0x57] sm:$0xff] }
  0xee   :  { %v113_v33 = vmul.f32 0.125, %v112_v32  ;;  %v114_v34 = vmul.f32 %v104_v31, %v104_v31  ;;  %v117_v38 = vsub.f32 %v95_v16, %v104_v31 }
  0xf0   :  { %v115_v35 = vsub.f32 %v113_v33, %v114_v34 }
  0xf2   :  { %v116_v36 = vmax.f32 %v115_v35, 0.0  ;;  %v462_v35 = vld [vmem:[%s1159_s1 + $0x62] sm:$0xff] }
  0xf4   :  { %v118_v37 = vadd.f32 1e-05, %v116_v36 }
  0xf6   :  { %944 = vrsqrt.f32 %v118_v37  ;;  %v464_v37 = vld [vmem:[%s1159_s1 + $0x72] sm:$0xff] }
 0x100   :  { %v945_v39 = vpop.eup %944 }
 0x101   :  { %v120_v41 = vmul.f32 %v945_v39, %v117_v38  ;;  %v465_v38 = vld [vmem:[%s1159_s1 + $0x7a] sm:$0xff] }
 0x102   :  { %v924_v39 = vpack.c.bf16 %v465_v38, %v464_v37 }
 0x103   :  { %v125_v43 = vmul.f32 %v794_v40, %v120_v41  ;;  %v802_v40 = vld [vmem:[%s1159_s1 + $0x5f] ss:$0 sm:$0xff] }
 0x105   :  { %v130_v44 = vadd.f32 %v795_v42, %v125_v43 }
 0x107   :  { %858 = vmatmul.mubr.msk.f32.vlgmr.msra.gmra.mrb[0].mxu1 %vm96_vm2, %v130_v44 }
 0x108   :  { %873 = vmatprep.mubr.msk.f32.mxu1 %vm961_vm0, %v962_v3  ;;  %872 = vmatpush3.msra.mxu1 %v345_v29 }
 0x109   :  { %926 = vmatprep.subr.bf16.mxu1 %v960_v0 }
 0x1da   :  { %v211_v52 = vpop.f32.mrb[0].mxu1 }
 0x1db   :  { %v212_v53 = vadd.f32 %v796_v51, %v211_v52  ;;  %v859_v54 = vpop.f32.mrb[1].mxu1 }
 0x1dd   :  { %v215_v55 = vmax.f32 %v212_v53, 0.0 }
 0x1df   :  { %v216_v56 = vsel %vm96_vm2, %v215_v55, 0.0  ;;  %v224_v57 = vmul.f32 %v215_v55, %v215_v55 }
 0x1e0   :  { %v217_v58 = vrot.slane %v216_v56, 4 }
 0x1e1   :  { %v225_v59 = vsel %vm96_vm2, %v224_v57, 0.0 }
 0x1e2   :  { %v218_v60 = vadd.f32 %v217_v58, %v216_v56  ;;  %v226_v61 = vrot.slane %v225_v59, 4 }
 0x1e4   :  { %v219_v62 = vrot.slane %v218_v60, 2  ;;  %v227_v63 = vadd.f32 %v226_v61, %v225_v59 }
 0x1e6   :  { %v220_v1 = vadd.f32 %v219_v62, %v218_v60  ;;  %v228_v2 = vrot.slane %v227_v63, 2 }
 0x1e8   :  { %v221_v4 = vrot.slane %v220_v1, 1  ;;  %v229_v6 = vadd.f32 %v228_v2, %v227_v63 }
 0x1ea   :  { %v222_v7 = vadd.f32 %v221_v4, %v220_v1  ;;  %v230_v8 = vrot.slane %v229_v6, 1 }
 0x1ec   :  { %v223_v9 = vmul.f32 0.125, %v222_v7  ;;  %v231_v10 = vadd.f32 %v230_v8, %v229_v6  ;;  %v804_v7 = vld [vmem:[%s1159_s1 + $0x60] ss:$0 sm:$0xff] }
 0x1ee   :  { %v232_v11 = vmul.f32 0.125, %v231_v10  ;;  %v233_v12 = vmul.f32 %v223_v9, %v223_v9  ;;  %v236_v16 = vsub.f32 %v215_v55, %v223_v9  ;;  %v663_v9 = vld [vmem:[%s1159_s1 + $0xa6] sm:$0xff]  ;;  %v664_v10 = vld [vmem:[%s1159_s1 + $0xae] sm:$0xff] }
 0x1f0   :  { %v234_v13 = vsub.f32 %v232_v11, %v233_v12  ;;  %v805_v11 = vld [vmem:[%s1159_s1 + $0x61] ss:$0 sm:$0xff] }
 0x1f2   :  { %v235_v14 = vmax.f32 %v234_v13, 0.0  ;;  %v933_v13 = vpack.c.bf16 %v664_v10, %v663_v9 }
 0x1f4   :  { %v237_v15 = vadd.f32 1e-05, %v235_v14 }
 0x1f6   :  { %946 = vrsqrt.f32 %v237_v15 }
 0x200   :  { %v947_v17 = vpop.eup %946 }
 0x201   :  { %v239_v19 = vmul.f32 %v947_v17, %v236_v16 }
 0x203   :  { %v244_v21 = vmul.f32 %v798_v18, %v239_v19  ;;  %v581_v18 = vld [vmem:[%s1159_s1 + $0x85] sm:$0xff]  ;;  %v582_v19 = vld [vmem:[%s1159_s1 + $0x8d] sm:$0xff] }
 0x205   :  { %v249_v22 = vadd.f32 %v799_v20, %v244_v21  ;;  %v927_v20 = vpack.c.bf16 %v582_v19, %v581_v18  ;;  %v584_v21 = vld [vmem:[%s1159_s1 + $0x9d] sm:$0xff] }
 0x207   :  { %869 = vmatmul.mubr.msk.f32.vlgmr.msra.gmra.mrb[2].mxu0 %vm96_vm2, %v249_v22 }
 0x208   :  { %884 = vmatprep.mubr.msk.f32.mxu0 %vm961_vm0, %v962_v3 }
 0x2da   :  { %v328_v24 = vpop.f32.mrb[2].mxu0 }
 0x2db   :  { %v1065_v25 = vadd.f32 %v800_v23, %v328_v24  ;;  %v870_v26 = vpop.f32.mrb[3].mxu0  ;;  %v806_v23 = vld [vmem:[%s1159_s1 + $0x82] ss:$0 sm:$0xff] }
 0x2dd   :  { %v332_v27 = vmul.f32 0.5, %v1065_v25 }
 0x2df   :  { %v333_v28 = vmul.f32 1.442695, %v332_v27 }
 0x2e1   :  { %948 = vpow2.f32 %v333_v28 }
 0x2eb   :  { %v949_v30 = vpop.eup %948 }
 0x2ec   :  { %336 = vrot.lane.b32.xlu0 %v949_v30, %s963_s18 }
 0x35e   :  { %v337_v31 = vpop.permute.xlu0 %336 }
 0x35f   :  { %v339_v32 = vmul.f32 %v337_v31, %v999_v5  ;;  %v463_v5 = vld [vmem:[%s1159_s1 + $0x6a] sm:$0xff] }
 0x360   :  { %v921_v36 = vpack.c.bf16 %v463_v5, %v462_v35 }
 0x361   :  { %341 = vrot.lane.b32.xlu0 %v339_v32, %s964_s0 }
 0x362   :  { %922 = vmatpush3.bf16.msra.mxu0 %v921_v36 }
 0x363   :  { %923 = vmatprep.subr.bf16.mxu0 %v960_v0 }
 0x366   :  { %925 = vmatpush3.bf16.msra.mxu0 %v924_v39 }
 0x367   :  { %932 = vmatprep.subr.bf16.mxu0 %v960_v0 }
 0x3d3   :  { %v342_v33 = vpop.permute.xlu0 %341 }
 0x3d4   :  { %v1074_v34 = vadd.f32 %v342_v33, %v1065_v25 }
 0x3d6   :  { %667 = vrot.lane.b32.xlu1 %v1074_v34, %s963_s18  ;;  %874 = vmatmul.mubr.msk.f32.vlgmr.msra.gmra.mrb[2].mxu1 %vm353_vm3, %v1074_v34  ;;  %v666_v16 = vmul.f32 %v1074_v34, %v1074_v34 }
 0x3d7   :  { %895 = vmatprep.mubr.msk.f32.mxu1 %vm961_vm0, %v962_v3  ;;  %928 = vmatpush3.bf16.msra.mxu1 %v927_v20 }
 0x3d8   :  { %929 = vmatprep.subr.bf16.mxu1 %v960_v0  ;;  %v812_v0 = vld [vmem:[%s1159_s1 + $0xb6] ss:$0 sm:$0xff] }
 0x448   :  { %v668_v15 = vpop.permute.xlu1 %667 }
 0x449   :  { %v670_v17 = vsel %vm353_vm3, %v666_v16, %v668_v15  ;;  %v810_v15 = vld [vmem:[%s1159_s1 + $0xa5] ss:$0 sm:$0xff] }
 0x4a9   :  { %v423_v41 = vpop.f32.mrb[2].mxu1 }
 0x4aa   :  { %v424_v42 = vadd.f32 %v802_v40, %v423_v41  ;;  %v875_v43 = vpop.f32.mrb[3].mxu1 }
 0x4ac   :  { %v427_v44 = vmax.f32 %v424_v42, 0.0 }
 0x4ae   :  { %v428_v45 = vsel %vm96_vm2, %v427_v44, 0.0  ;;  %v436_v46 = vmul.f32 %v427_v44, %v427_v44 }
 0x4af   :  { %v429_v47 = vrot.slane %v428_v45, 4 }
 0x4b0   :  { %v437_v48 = vsel %vm96_vm2, %v436_v46, 0.0 }
 0x4b1   :  { %v430_v49 = vadd.f32 %v429_v47, %v428_v45  ;;  %v438_v50 = vrot.slane %v437_v48, 4 }
 0x4b3   :  { %v431_v51 = vrot.slane %v430_v49, 2  ;;  %v439_v52 = vadd.f32 %v438_v50, %v437_v48 }
 0x4b5   :  { %v432_v53 = vadd.f32 %v431_v51, %v430_v49  ;;  %v440_v54 = vrot.slane %v439_v52, 2 }
 0x4b7   :  { %v433_v55 = vrot.slane %v432_v53, 1  ;;  %v441_v56 = vadd.f32 %v440_v54, %v439_v52 }
 0x4b9   :  { %v434_v57 = vadd.f32 %v433_v55, %v432_v53  ;;  %v442_v58 = vrot.slane %v441_v56, 1 }
 0x4bb   :  { %v435_v59 = vmul.f32 0.125, %v434_v57  ;;  %v443_v60 = vadd.f32 %v442_v58, %v441_v56  ;;  %v808_v56 = vld [vmem:[%s1159_s1 + $0x83] ss:$0 sm:$0xff]  ;;  %v809_v58 = vld [vmem:[%s1159_s1 + $0x84] ss:$0 sm:$0xff] }
 0x4bd   :  { %v444_v61 = vmul.f32 0.125, %v443_v60  ;;  %v445_v62 = vmul.f32 %v435_v59, %v435_v59  ;;  %v448_v4 = vsub.f32 %v427_v44, %v435_v59 }
 0x4bf   :  { %v446_v63 = vsub.f32 %v444_v61, %v445_v62 }
 0x4c1   :  { %v447_v1 = vmax.f32 %v446_v63, 0.0 }
 0x4c3   :  { %v449_v2 = vadd.f32 1e-05, %v447_v1 }
 0x4c5   :  { %950 = vrsqrt.f32 %v449_v2 }
 0x4cf   :  { %v951_v6 = vpop.eup %950 }
 0x4d0   :  { %v451_v8 = vmul.f32 %v951_v6, %v448_v4 }
 0x4d2   :  { %v456_v12 = vmul.f32 %v804_v7, %v451_v8 }
 0x4d4   :  { %v461_v14 = vadd.f32 %v805_v11, %v456_v12 }
 0x4d6   :  { %885 = vmatmul.mubr.msk.f32.vlgmr.msra.gmra.mrb[4].mxu0 %vm96_vm2, %v461_v14 }
 0x4d7   :  { %934 = vmatpush3.bf16.msra.mxu0 %v933_v13  ;;  %902 = vmatprep.mubr.msk.f32.mxu0 %vm961_vm0, %v962_v3  ;;  %v583_v3 = vld [vmem:[%s1159_s1 + $0x95] sm:$0xff] }
 0x4d8   :  { %v930_v22 = vpack.c.bf16 %v584_v21, %v583_v3 }
 0x4da   :  { %903 = vmatmul.mubr.msk.f32.vlgmr.msra.gmra.mrb[6].mxu0 %vm21_vm1, %v670_v17  ;;  %931 = vmatpush3.bf16.msra.mxu1 %v930_v22 }
 0x5a9   :  { %v542_v24 = vpop.f32.mrb[4].mxu0 }
 0x5aa   :  { %v543_v26 = vadd.f32 %v806_v23, %v542_v24  ;;  %v886_v27 = vpop.f32.mrb[5].mxu0 }
 0x5ac   :  { %v546_v28 = vmax.f32 %v543_v26, 0.0 }
 0x5ad   :  { %v744_v29 = vpop.f32.mrb[6].mxu0 }
 0x5ae   :  { %v547_v30 = vsel %vm96_vm2, %v546_v28, 0.0  ;;  %v555_v31 = vmul.f32 %v546_v28, %v546_v28  ;;  %v745_v32 = vadd.f32 %v812_v0, %v744_v29  ;;  %v904_v33 = vpop.f32.mrb[7].mxu0 }
 0x5af   :  { %v548_v35 = vrot.slane %v547_v30, 4 }
 0x5b0   :  { %v556_v5 = vsel %vm96_vm2, %v555_v31, 0.0  ;;  %v749_v36 = vsel %vm748_vm4, %v745_v32, -inf }
 0x5b1   :  { %v549_v37 = vadd.f32 %v548_v35, %v547_v30  ;;  %v557_v38 = vrot.slane %v556_v5, 4  ;;  %750 = vmax.xlane.f32.xlu1 %v749_v36 }
 0x5b3   :  { %v550_v39 = vrot.slane %v549_v37, 2  ;;  %v558_v40 = vadd.f32 %v557_v38, %v556_v5 }
 0x5b5   :  { %v551_v41 = vadd.f32 %v550_v39, %v549_v37  ;;  %v559_v42 = vrot.slane %v558_v40, 2 }
 0x5b7   :  { %v552_v43 = vrot.slane %v551_v41, 1  ;;  %v560_v44 = vadd.f32 %v559_v42, %v558_v40 }
 0x5b9   :  { %v553_v45 = vadd.f32 %v552_v43, %v551_v41  ;;  %v561_v46 = vrot.slane %v560_v44, 1 }
 0x5bb   :  { %v554_v47 = vmul.f32 0.125, %v553_v45  ;;  %v562_v48 = vadd.f32 %v561_v46, %v560_v44 }
 0x5bd   :  { %v563_v49 = vmul.f32 0.125, %v562_v48  ;;  %v564_v50 = vmul.f32 %v554_v47, %v554_v47  ;;  %v567_v54 = vsub.f32 %v546_v28, %v554_v47 }
 0x5bf   :  { %v565_v51 = vsub.f32 %v563_v49, %v564_v50 }
 0x5c1   :  { %v566_v52 = vmax.f32 %v565_v51, 0.0 }
 0x5c2   :  { %772 = vrot.lane.b32.xlu1 %v1074_v34, %s965_s20 }
 0x5c3   :  { %v568_v53 = vadd.f32 1e-05, %v566_v52 }
 0x5c5   :  { %952 = vrsqrt.f32 %v568_v53 }
 0x5cf   :  { %v953_v55 = vpop.eup %952 }
 0x5d0   :  { %v570_v57 = vmul.f32 %v953_v55, %v567_v54 }
 0x5d2   :  { %v575_v59 = vmul.f32 %v808_v56, %v570_v57 }
 0x5d4   :  { %v580_v60 = vadd.f32 %v809_v58, %v575_v59 }
 0x5d6   :  { %896 = vmatmul.mubr.msk.f32.vlgmr.msra.gmra.mrb[4].mxu1 %vm96_vm2, %v580_v60 }
 0x63e   :  { %v751_v61 = vpop.xlane.xlu1 %750 }
 0x63f   :  { %vm752_vm5 = vweird.f32 %v751_v61 }
 0x640   :  { %vm753_vm7 = vmxor %vm752_vm5, %vm966_vm6 }
 0x641   :  { %v754_v34 = vsel %vm753_vm7, %v751_v61, 0.0 }
 0x642   :  { %v755_v62 = vsub.f32 %v745_v32, %v754_v34  ;;  %v773_v18 = vpop.permute.xlu1 %772 }
 0x644   :  { %v756_v63 = vmul.f32 1.442695, %v755_v62 }
 0x646   :  { %954 = vpow2.f32 %v756_v63 }
 0x650   :  { %v955_v1 = vpop.eup %954 }
 0x651   :  { %v758_v2 = vsel %vm748_vm4, %v955_v1, 0.0 }
 0x652   :  { %759 = vadd.xlane.f32.xlu0 %v758_v2 }
 0x668   :  { %769 = vrot.lane.b32.xlu0 %v1065_v25, %s967_s25 }
 0x6a9   :  { %v659_v4 = vpop.f32.mrb[4].mxu1 }
 0x6aa   :  { %v897_v6 = vpop.f32.mrb[5].mxu1  ;;  %v660_v25 = vadd.f32 %v810_v15, %v659_v4 }
 0x6df   :  { %v760_v7 = vpop.xlane.xlu0 %759 }
 0x6e0   :  { %v761_v8 = vand.u32 2147483647, %v760_v7 }
 0x6e2   :  { %956 = vlog2.f32 %v761_v8 }
 0x6e3   :  { %v770_v16 = vpop.permute.xlu0 %769 }
 0x6e4   :  { %v779_v17 = vsel %vm21_vm1, %v660_v25, %v770_v16 }
 0x6e5   :  { %v781_v19 = vsel %vm780_vm8, %v779_v17, %v770_v16 }
 0x6e6   :  { %v782_v20 = vsel %vm96_vm2, %v781_v19, %v773_v18 }
 0x6ec   :  { %v957_v9 = vpop.eup %956 }
 0x6ed   :  { %v763_v10 = vmul.f32 0.6931472, %v957_v9 }
 0x6ef   :  { %v764_v11 = vadd.f32 %v763_v10, %v754_v34 }
 0x6f1   :  { %v765_v12 = vsub.f32 %v745_v32, %v764_v11 }
 0x6f3   :  { %v766_v13 = vmul.f32 1.442695, %v765_v12 }
 0x6f5   :  { %958 = vpow2.f32 %v766_v13 }
 0x6ff   :  { %v959_v14 = vpop.eup %958 }
 0x700   :  { %776 = vrot.lane.b32.xlu1 %v959_v14, %s968_s26 }
 0x772   :  { %v777_v3 = vpop.permute.xlu1 %776 }
 0x773   :  { %v784_v21 = vsel %vm783_vm9, %v782_v20, %v777_v3 }
 0x774   :  { %v786_v22 = vsel %vm785_vm10, %v784_v21, 0.0 }
 0x775   :  { %787 = vst [vmem:[%s1161_s2] sm:$0xff] %v786_v22 }

</bundles_post_ra>
